<compile_context>
chip_gen: v6e
topology: v6e:2x2x1
jax: 0.10.0
libtpu: 0.0.40
codegen_flags: <defaults>
</compile_context>

<pallas_src>
import math
import functools

import jax
import jax.numpy as jnp
from jax.experimental import pallas as pl
from jax.experimental.pallas import tpu as pltpu


def _round_up(x, m):
    return (x + m - 1) // m * m


def _encode_pool_kernel(emb_ref, maskf_ref, cnt_ref, w_ref, b_ref,
                        out_ref, acc_ref):
    """One (batch_tile, seq_tile) step of: tanh(emb @ W + b) -> masked sum.
    Finalizes (mean + L2 norm) on the last sequence step."""
    j = pl.program_id(1)

    @pl.when(j == 0)
    def _init():
        acc_ref[...] = jnp.zeros_like(acc_ref)

    tb, ts, H = emb_ref.shape
    n = tb * ts

    # Dense encoder layer on the MXU: bf16 inputs, f32 accumulation.
    x = jnp.dot(emb_ref[...].reshape(n, H), w_ref[...],
                preferred_element_type=jnp.float32)
    x = jnp.tanh(x + b_ref[...])                       # f32 elementwise (v5e-safe)

    # Masked sum over the sequence tile, pushed to the MXU with a
    # block-diagonal selection matrix:
    #   sel[r, c] = mask[r, c - r*ts]  for  r*ts <= c < (r+1)*ts, else 0
    # so  (sel @ x)[r, h] = sum_s mask[r, s] * x[r, s, h].
    mf = maskf_ref[...].reshape(1, n)                  # lane-flattened mask tile
    row = jax.lax.broadcasted_iota(jnp.int32, (tb, n), 0)
    col = jax.lax.broadcasted_iota(jnp.int32, (tb, n), 1)
    in_blk = (col >= row * ts) & (col < (row + 1) * ts)
    sel = jnp.where(in_blk, jnp.broadcast_to(mf, (tb, n)), 0.0)
    acc_ref[...] += jnp.dot(sel, x, preferred_element_type=jnp.float32)

    @pl.when(j == pl.num_programs(1) - 1)
    def _finalize():
        cnt = jnp.maximum(cnt_ref[...], 1.0)           # (tb, 1); guard empty rows
        pooled = acc_ref[...] * pl.reciprocal(cnt, approx=True)
        ssq = jnp.sum(pooled * pooled, axis=-1, keepdims=True)
        pooled = pooled * jax.lax.rsqrt(jnp.maximum(ssq, 1e-30))
        out_ref[...] = pooled.astype(out_ref.dtype)


def _similarity_kernel(v1_ref, v2_ref, out_ref):
    # sim = v1 @ v2.T expressed as a last-dim contraction (no XLU transpose).
    out_ref[...] = jax.lax.dot_general(
        v1_ref[...], v2_ref[...],
        dimension_numbers=(((1,), (1,)), ((), ())),
        preferred_element_type=jnp.float32)


def sentence_similarity(sentence1, sentence2, label, params, *, tb=8, ts=None):
    """Wrapper mirroring Model.forward(sentence1, sentence2, label).
    `label` is unused (as in the reference forward)."""
    del label
    embed = params["embed"]                            # (V, H) f32
    w = params["w"].astype(jnp.bfloat16)               # (H, H) bf16 for the MXU
    b = params["b"].astype(jnp.float32).reshape(1, -1) # (1, H) f32
    H = w.shape[1]

    ids1, m1 = sentence1["input_ids"], sentence1["attention_mask"]
    ids2, m2 = sentence2["input_ids"], sentence2["attention_mask"]
    B, S = ids1.shape

    if ts is None:
        ts = 128 if S % 128 == 0 else S
    assert S % ts == 0 and (ts % 8 == 0 or ts == S), (S, ts)

    # Pad each sentence's batch to a sublane multiple so tiles are (8, .)-aligned.
    Bp = _round_up(B, tb)

    def prep(ids, m):
        emb = embed[ids].astype(jnp.bfloat16)          # glue: embedding gather (bf16 halves DMA)
        mf32 = m.astype(jnp.float32)
        if Bp != B:
            emb = jnp.pad(emb, ((0, Bp - B), (0, 0), (0, 0)))
            mf32 = jnp.pad(mf32, ((0, Bp - B), (0, 0)))
        return emb, mf32

    e1, mk1 = prep(ids1, m1)
    e2, mk2 = prep(ids2, m2)
    emb = jnp.concatenate([e1, e2], axis=0)            # (2Bp, S, H) — one fused encode pass
    mask = jnp.concatenate([mk1, mk2], axis=0)         # (2Bp, S)

    BB = 2 * Bp
    nb, ns = BB // tb, S // ts

    counts = jnp.sum(mask, axis=1, keepdims=True)      # (2Bp, 1) f32 token counts
    # Pre-flatten each (tb, ts) mask tile onto the lane axis so the kernel
    # never does a cross-lane relayout of the mask.
    maskf = (mask.reshape(nb, tb, ns, ts)
                 .transpose(0, 2, 1, 3)
                 .reshape(nb, ns, 1, tb * ts))

    # VMEM budget for the chosen tiles (double-buffered inputs/outputs + scratch).
    tile_bytes = (tb * ts * H * 2          # emb block (bf16)
                  + tb * ts * 4            # mask block
                  + tb * 4                 # counts block
                  + H * H * 2 + H * 4      # W + b (resident)
                  + tb * H * 4)            # out block
    vmem_limit = int(min(48 * 2 ** 20, max(2 * 2 * tile_bytes + tb * H * 4,
                                           1 * 2 ** 20)))

    pooled = pl.pallas_call(
        _encode_pool_kernel,
        out_shape=jax.ShapeDtypeStruct((BB, H), jnp.float32),
        grid_spec=pltpu.PrefetchScalarGridSpec(
            num_scalar_prefetch=0,
            grid=(nb, ns),
            in_specs=[
                pl.BlockSpec((tb, ts, H), lambda i, j: (i, j, 0)),          # emb
                pl.BlockSpec((1, 1, 1, tb * ts), lambda i, j: (i, j, 0, 0)),  # flat mask
                pl.BlockSpec((tb, 1), lambda i, j: (i, 0)),                 # counts
                pl.BlockSpec((H, H), lambda i, j: (0, 0)),                  # W (resident)
                pl.BlockSpec((1, H), lambda i, j: (0, 0)),                  # b (resident)
            ],
            out_specs=pl.BlockSpec((tb, H), lambda i, j: (i, 0)),
            scratch_shapes=[pltpu.VMEM((tb, H), jnp.float32)],
        ),
        compiler_params=pltpu.CompilerParams(
            dimension_semantics=("parallel", "arbitrary"),
            vmem_limit_bytes=vmem_limit,
        ),
    )(emb, maskf, counts, w, b)

    v1 = pooled[:Bp]                                    # (Bp, H) normalized sentence-1 vectors
    v2 = pooled[Bp:]                                    # (Bp, H) normalized sentence-2 vectors

    vmem = pl.BlockSpec(memory_space=pltpu.MemorySpace.VMEM)
    sim = pl.pallas_call(
        _similarity_kernel,
        out_shape=jax.ShapeDtypeStruct((Bp, Bp), jnp.float32),
        in_specs=[vmem, vmem],
        out_specs=vmem,
    )(v1, v2)
    return sim[:B, :B]


def _reference(sentence1, sentence2, params):
    """Pure-JAX reference (same bf16 matmul precision as the kernel path)."""
    w = params["w"].astype(jnp.bfloat16)
    b = params["b"].astype(jnp.float32)

    def enc(sent):
        emb = params["embed"][sent["input_ids"]].astype(jnp.bfloat16)
        x = jnp.dot(emb, w, preferred_element_type=jnp.float32) + b
        x = jnp.tanh(x)
        m = sent["attention_mask"].astype(jnp.float32)[..., None]
        pooled = (m * x).sum(-2) / jnp.maximum(m.sum(-2), 1.0)
        return pooled / jnp.sqrt((pooled ** 2).sum(-1, keepdims=True))

    v1, v2 = enc(sentence1), enc(sentence2)
    return v1 @ v2.T


if __name__ == "__main__":
    key = jax.random.PRNGKey(0)
    B, S, H, V = 2, 16, 32, 64   # batch, seq len, hidden, vocab (small demo shapes)

    k_emb, k_w, k_b, k_id1, k_id2 = jax.random.split(key, 5)
    params = {
        "embed": jax.random.normal(k_emb, (V, H), dtype=jnp.float32) * 0.1,
        "w":     jax.random.normal(k_w, (H, H), dtype=jnp.float32) * (1.0 / math.sqrt(H)),
        "b":     jax.random.normal(k_b, (1, H), dtype=jnp.float32) * 0.01,
    }

    def make_sentence(k_ids, lengths):
        ids = jax.random.randint(k_ids, (B, S), 0, V, dtype=jnp.int32)
        pos = jnp.arange(S)[None, :]
        mask = (pos < lengths[:, None]).astype(jnp.int32)
        return {"input_ids": ids, "attention_mask": mask}

    sentence1 = make_sentence(k_id1, jnp.array([S, S - 5], dtype=jnp.int32))
    sentence2 = make_sentence(k_id2, jnp.array([S - 3, S], dtype=jnp.int32))
    label = jnp.zeros((B,), dtype=jnp.int32)   # unused by forward

    # ts=8 with S=16 exercises the sequence-accumulation ("arbitrary") grid axis;
    # batch padding to 8 per sentence gives 2 tiles on the "parallel" axis.
    sim = sentence_similarity(sentence1, sentence2, label, params, tb=8, ts=8)
    sim = jax.block_until_ready(sim)

    ref = _reference(sentence1, sentence2, params)
    assert sim.shape == (B, B)
    assert jnp.allclose(sim, ref, atol=1e-3, rtol=1e-3), (sim, ref)

    print("KERNEL_OK")
</pallas_src>

<mosaic_0001>
module attributes {stable_mosaic.version = 11 : i64} {
  func.func @_encode_pool_kernel(%arg0: i32, %arg1: i32, %arg2: memref<8x8x32xbf16, #tpu.memory_space<vmem>>, %arg3: memref<1x1x1x64xf32, #tpu.memory_space<vmem>>, %arg4: memref<8x1xf32, #tpu.memory_space<vmem>>, %arg5: memref<32x32xbf16, #tpu.memory_space<vmem>>, %arg6: memref<1x32xf32, #tpu.memory_space<vmem>>, %arg7: memref<8x32xf32, #tpu.memory_space<vmem>>, %arg8: memref<8x32xf32, #tpu.memory_space<vmem>>) attributes {dimension_semantics = [#tpu.dimension_semantics<parallel>, #tpu.dimension_semantics<arbitrary>], iteration_bounds = array<i64: 2, 2>, scalar_prefetch = 0 : i64, scratch_operands = 1 : i64, tpu.core_type = #tpu.core_type<tc>, window_params = [{transform_indices = @transform_0, window_bounds = array<i64: 8, 8, 32>}, {transform_indices = @transform_1, window_bounds = array<i64: 1, 1, 1, 64>}, {transform_indices = @transform_2, window_bounds = array<i64: 8, 1>}, {pipeline_mode = #tpu.pipeline_mode<synchronous>, transform_indices = @transform_3, window_bounds = array<i64: 32, 32>}, {pipeline_mode = #tpu.pipeline_mode<synchronous>, transform_indices = @transform_4, window_bounds = array<i64: 1, 32>}, {transform_indices = @transform_5, window_bounds = array<i64: 8, 32>}]} {
    %c0_i32 = arith.constant 0 : i32
    %0 = arith.cmpi eq, %arg1, %c0_i32 : i32
    %1 = arith.extui %0 : i1 to i32
    %c0_i32_0 = arith.constant 0 : i32
    %2 = arith.cmpi ne, %1, %c0_i32_0 : i32
    scf.if %2 {
      %cst_20 = arith.constant 0.000000e+00 : f32
      %35 = vector.broadcast %cst_20 : f32 to vector<8x32xf32>
      %c0_21 = arith.constant 0 : index
      %c0_22 = arith.constant 0 : index
      %36 = vector.load %arg8[%c0_21, %c0_22] : memref<8x32xf32, #tpu.memory_space<vmem>>, vector<8x32xf32>
      tpu.vector_store %arg8[%c0_21, %c0_22], %35 {strides = array<i32>} : memref<8x32xf32, #tpu.memory_space<vmem>>, vector<8x32xf32>,
    } else {
    }
    %c0 = arith.constant 0 : index
    %c0_1 = arith.constant 0 : index
    %c0_2 = arith.constant 0 : index
    %3 = vector.load %arg2[%c0, %c0_1, %c0_2] : memref<8x8x32xbf16, #tpu.memory_space<vmem>>, vector<8x8x32xbf16>
    %4 = vector.shape_cast %3 : vector<8x8x32xbf16> to vector<64x32xbf16>
    %c0_3 = arith.constant 0 : index
    %c0_4 = arith.constant 0 : index
    %5 = vector.load %arg5[%c0_3, %c0_4] : memref<32x32xbf16, #tpu.memory_space<vmem>>, vector<32x32xbf16>
    %cst = arith.constant dense<0.000000e+00> : vector<64x32xf32>
    %6 = tpu.matmul %4, %5, %cst {dimension_numbers = #tpu.dot_dimension_numbers<[1], [0], [0], [1], [0, 0, 1, 1], [], []>} : vector<64x32xbf16>, vector<32x32xbf16>, vector<64x32xf32> -> vector<64x32xf32>
    %c0_5 = arith.constant 0 : index
    %c0_6 = arith.constant 0 : index
    %7 = vector.load %arg6[%c0_5, %c0_6] : memref<1x32xf32, #tpu.memory_space<vmem>>, vector<1x32xf32>
    %8 = vector.broadcast %7 : vector<1x32xf32> to vector<64x32xf32>
    %9 = arith.addf %6, %8 : vector<64x32xf32>
    %10 = math.tanh %9 : vector<64x32xf32>
    %c0_7 = arith.constant 0 : index
    %c0_8 = arith.constant 0 : index
    %c0_9 = arith.constant 0 : index
    %c0_10 = arith.constant 0 : index
    %11 = vector.load %arg3[%c0_7, %c0_8, %c0_9, %c0_10] : memref<1x1x1x64xf32, #tpu.memory_space<vmem>>, vector<1x1x1x64xf32>
    %12 = vector.shape_cast %11 : vector<1x1x1x64xf32> to vector<1x64xf32>
    %13 = tpu.iota {dimensions = array<i32: 0>} : vector<8x64xi32>
    %14 = tpu.iota {dimensions = array<i32: 1>} : vector<8x64xi32>
    %c8_i32 = arith.constant 8 : i32
    %15 = vector.broadcast %c8_i32 : i32 to vector<8x64xi32>
    %16 = arith.muli %13, %15 : vector<8x64xi32>
    %17 = arith.cmpi sge, %14, %16 : vector<8x64xi32>
    %c1_i32 = arith.constant 1 : i32
    %18 = vector.broadcast %c1_i32 : i32 to vector<8x64xi32>
    %19 = arith.addi %13, %18 : vector<8x64xi32>
    %c8_i32_11 = arith.constant 8 : i32
    %20 = vector.broadcast %c8_i32_11 : i32 to vector<8x64xi32>
    %21 = arith.muli %19, %20 : vector<8x64xi32>
    %22 = arith.cmpi slt, %14, %21 : vector<8x64xi32>
    %23 = arith.andi %17, %22 : vector<8x64xi1>
    %24 = vector.shape_cast %12 : vector<1x64xf32> to vector<1x64xf32>
    %25 = vector.broadcast %24 : vector<1x64xf32> to vector<8x64xf32>
    %cst_12 = arith.constant 0.000000e+00 : f32
    %26 = vector.broadcast %cst_12 : f32 to vector<8x64xf32>
    %27 = arith.select %23, %25, %26 : vector<8x64xi1>, vector<8x64xf32>
    %c0_13 = arith.constant 0 : index
    %c0_14 = arith.constant 0 : index
    %28 = vector.load %arg8[%c0_13, %c0_14] : memref<8x32xf32, #tpu.memory_space<vmem>>, vector<8x32xf32>
    %cst_15 = arith.constant dense<0.000000e+00> : vector<8x32xf32>
    %29 = tpu.matmul %27, %10, %cst_15 {dimension_numbers = #tpu.dot_dimension_numbers<[1], [0], [0], [1], [0, 0, 1, 1], [], []>} : vector<8x64xf32>, vector<64x32xf32>, vector<8x32xf32> -> vector<8x32xf32>
    %30 = arith.addf %28, %29 : vector<8x32xf32>
    %c0_16 = arith.constant 0 : index
    %c0_17 = arith.constant 0 : index
    %31 = vector.load %arg8[%c0_16, %c0_17] : memref<8x32xf32, #tpu.memory_space<vmem>>, vector<8x32xf32>
    tpu.vector_store %arg8[%c0_16, %c0_17], %30 {strides = array<i32>} : memref<8x32xf32, #tpu.memory_space<vmem>>, vector<8x32xf32>,
    %c1_i32_18 = arith.constant 1 : i32
    %32 = arith.cmpi eq, %arg1, %c1_i32_18 : i32
    %33 = arith.extui %32 : i1 to i32
    %c0_i32_19 = arith.constant 0 : i32
    %34 = arith.cmpi ne, %33, %c0_i32_19 : i32
    scf.if %34 {
      %c0_20 = arith.constant 0 : index
      %c0_21 = arith.constant 0 : index
      %35 = vector.load %arg4[%c0_20, %c0_21] : memref<8x1xf32, #tpu.memory_space<vmem>>, vector<8x1xf32>
      %cst_22 = arith.constant 1.000000e+00 : f32
      %36 = vector.broadcast %cst_22 : f32 to vector<8x1xf32>
      %37 = arith.maximumf %35, %36 : vector<8x1xf32>
      %c0_23 = arith.constant 0 : index
      %c0_24 = arith.constant 0 : index
      %38 = vector.load %arg8[%c0_23, %c0_24] : memref<8x32xf32, #tpu.memory_space<vmem>>, vector<8x32xf32>
      %39 = tpu.reciprocal %37 {approx = true} : vector<8x1xf32> -> vector<8x1xf32>
      %40 = vector.broadcast %39 : vector<8x1xf32> to vector<8x32xf32>
      %41 = arith.mulf %38, %40 : vector<8x32xf32>
      %42 = arith.mulf %41, %41 : vector<8x32xf32>
      %cst_25 = arith.constant dense<0.000000e+00> : vector<8xf32>
      %43 = vector.multi_reduction <add>, %42, %cst_25 [1] : vector<8x32xf32> to vector<8xf32>
      %44 = vector.shape_cast %43 : vector<8xf32> to vector<8x1xf32>
      %cst_26 = arith.constant 1.000000e-30 : f32
      %45 = vector.broadcast %cst_26 : f32 to vector<8x1xf32>
      %46 = arith.maximumf %44, %45 : vector<8x1xf32>
      %47 = math.rsqrt %46 : vector<8x1xf32>
      %48 = vector.broadcast %47 : vector<8x1xf32> to vector<8x32xf32>
      %49 = arith.mulf %41, %48 : vector<8x32xf32>
      %c0_27 = arith.constant 0 : index
      %c0_28 = arith.constant 0 : index
      %50 = vector.load %arg7[%c0_27, %c0_28] : memref<8x32xf32, #tpu.memory_space<vmem>>, vector<8x32xf32>
      tpu.vector_store %arg7[%c0_27, %c0_28], %49 {strides = array<i32>} : memref<8x32xf32, #tpu.memory_space<vmem>>, vector<8x32xf32>,
    } else {
    }
    return
  }
  func.func @transform_0(%arg0: i32, %arg1: i32) -> (i32, i32, i32) {
    %c0_i32 = arith.constant 0 : i32
    %c0_i32_0 = arith.constant 0 : i32
    return %arg0, %arg1, %c0_i32 : i32, i32, i32
  }
  func.func @transform_1(%arg0: i32, %arg1: i32) -> (i32, i32, i32, i32) {
    %c0_i32 = arith.constant 0 : i32
    %c0_i32_0 = arith.constant 0 : i32
    %c0_i32_1 = arith.constant 0 : i32
    return %arg0, %arg1, %c0_i32, %c0_i32_0 : i32, i32, i32, i32
  }
  func.func @transform_2(%arg0: i32, %arg1: i32) -> (i32, i32) {
    %c0_i32 = arith.constant 0 : i32
    %c0_i32_0 = arith.constant 0 : i32
    return %arg0, %c0_i32 : i32, i32
  }
  func.func @transform_3(%arg0: i32, %arg1: i32) -> (i32, i32) {
    %c0_i32 = arith.constant 0 : i32
    %c0_i32_0 = arith.constant 0 : i32
    %c0_i32_1 = arith.constant 0 : i32
    return %c0_i32, %c0_i32_0 : i32, i32
  }
  func.func @transform_4(%arg0: i32, %arg1: i32) -> (i32, i32) {
    %c0_i32 = arith.constant 0 : i32
    %c0_i32_0 = arith.constant 0 : i32
    %c0_i32_1 = arith.constant 0 : i32
    return %c0_i32, %c0_i32_0 : i32, i32
  }
  func.func @transform_5(%arg0: i32, %arg1: i32) -> (i32, i32) {
    %c0_i32 = arith.constant 0 : i32
    %c0_i32_0 = arith.constant 0 : i32
    return %arg0, %c0_i32 : i32, i32
  }
}

</mosaic_0001>

<bundles_post_ra>
// kernel: tpu_custom_call.1
= control target key start
LH: loop header
LB: loop body
LE: loop exit
PB: predicated region body
PF: predicated region fallthrough
CT: control target
= control target key end

     0   :  { %s1326_s0 = inlined_call_operand.hbm [shape: bf16[16,16,32], index: 0, kind: input, shape index: {}]   ;;  %s1327_s1 = inlined_call_operand.vmem [shape: f32[2,2,1,64], index: 1, kind: input, shape index: {}]   ;;  %s1328_s2 = inlined_call_operand.vmem [shape: f32[16,1], index: 2, kind: input, shape index: {}]   ;;  %s1329_s3 = inlined_call_operand.vmem [shape: bf16[32,32], index: 3, kind: input, shape index: {}]   ;;  %s1330_s4 = inlined_call_operand.vmem [shape: f32[1,32], index: 4, kind: input, shape index: {}]   ;;  %s1331_s5 = inlined_call_operand.hbm [shape: f32[16,32], index: 5, kind: output, shape index: {}]  }
   0x1   :  { %1338 = sst [smem:[#allocation14_spill]] %s1331_s5 }
   0x2   :  { %10 = vsyncpa [#allocation4], 0 }
   0x3   :  { %12 = vsyncpa [#allocation4 + $0x1], 0 }
   0x4   :  { %13 = vsyncpa [#allocation5], 0 }
   0x5   :  { %15 = vsyncpa [#allocation5 + $0x1], 0  ;;  %s1094_s18 = smov 0   ;;  %s1096_s19 = smov 0  }
   0x6   :  { %s1098_s20 = smov 0   ;;  %s1100_s21 = smov 0  }
   0x7   :  { %s1102_s22 = smov 0   ;;  %s1104_s23 = smov 0  }
   0x8   :  { %s1106_s24 = smov 0   ;;  %s1108_s25 = smov 0  }
   0x9   :  { %s1110_s26 = smov 0   ;;  %s1112_s27 = smov 0  }
   0xa   :  { %s1114_s28 = smov 0  }
   0xb LB: > { %1339 = sst [smem:[#allocation9_spill]] %s1033_s23  ;;  %s690_s29 = sadd.s32 4294967295, %s1053_s28   ;;  %s1053_s28 = sphi %s1114_s28, %s21_s28   ;;  %s1049_s27 = sphi %s1112_s27, %s1363_s27   ;;  %s1045_s26 = sphi %s1110_s26, %s1362_s26   ;;  %s1041_s25 = sphi %s1108_s25, %s1361_s25   ;;  %s1037_s24 = sphi %s1106_s24, %s1360_s24   ;;  %s1033_s23 = sphi %s1104_s23, %s1352_s23   ;;  %s1029_s22 = sphi %s1102_s22, %s1359_s22   ;;  %s1025_s21 = sphi %s1100_s21, %s1358_s21   ;;  %s1021_s20 = sphi %s1098_s20, %s1357_s20   ;;  %s1017_s19 = sphi %s1096_s19, %s1356_s19   ;;  %s1013_s18 = sphi %s1094_s18, %s1355_s18  }
   0xc   : > { %s691_s30 = sadd.s32 4294967294, %s1053_s28   ;;  %s30_s6 = sadd.s32 1, %s1045_s26 }
   0xd   : > { %s33_s7 = sadd.s32 1, %s1049_s27  ;;  %p31_p0 = scmp.ge.s32.totalorder %s30_s6, 2 }
   0xe   : > { %s42_s8 = sadd.s32 1, %s1033_s23  ;;  %p49_p1 = scmp.ne.s32.totalorder %s1033_s23, %s1029_s22 }
   0xf   : > { %p50_p2 = scmp.eq.s32.totalorder %s1053_s28, 0  ;;  %s1365_s6 = smov (%p31_p0, %s30_s6), 0 }
  0x10   : > { %1340 = sst [smem:[#allocation10_spill]] %s1365_s6  ;;  %s1367_s7 = smov (!%p31_p0, %s33_s7), %s1049_s27 }
  0x11   : > { %s38_s9 = ssub.s32 %s1045_s26, %s1365_s6  ;;  %p1160_p3 = por %p50_p2, %p49_p1 }
  0x12   : > { %p35_p4 = scmp.ge.s32.totalorder %s1367_s7, 2  ;;  %p55_p5 = scmp.ne.s32.totalorder %s1029_s22, %s1025_s21 }
  0x13   : > { %p56_p6 = scmp.eq.s32.totalorder %s690_s29, 0  ;;  %s164_s11 = sadd.s32 1, %s1021_s20 }
  0x14   : > { %s1369_s7 = smov (%p35_p4, %s1367_s7), 0  ;;  %p174_p8 = scmp.ne.s32.totalorder %s1021_s20, %s1017_s19 }
  0x15   : > { %1342 = sst [smem:[#allocation11_spill]] %s1369_s7  ;;  %p1168_p7 = por %p56_p6, %p55_p5 }
  0x16   : > { %s37_s13 = ssub.s32 %s1049_s27, %s1369_s7  ;;  %p175_p9 = scmp.eq.s32.totalorder %s690_s29, 3 }
  0x17   : > { %s39_s14 = sor.u32 %s38_s9, %s37_s13  ;;  %p162_p10 = scmp.eq.s32.totalorder %s37_s13, 0 }
  0x18   : > { %p40_p11 = scmp.eq.s32.totalorder %s39_s14, 0  ;;  %p1176_p12 = por %p175_p9, %p174_p8 }
  0x19   : > { %s1181_s16 = scalar_select %p162_p10, %s1021_s20, %s164_s11  }
  0x1a   : > { %s1344_s15 = scalar_select %p1176_p12, 1, 0 }
  0x1b   : > { %s1184_s17 = scalar_select %p40_p11, %s1033_s23, %s42_s8  }
  0x1c   : > { %1345 = sst [smem:[#allocation12_spill]] %s1344_s15  ;;  %p180_p13 = scmp.ne.s32.totalorder %s1017_s19, %s1013_s18 }
  0x1d   : > { %1346 = sst [smem:[#allocation13_spill]] %s1184_s17  ;;  %p181_p0 = scmp.eq.s32.totalorder %s691_s30, 3 }
  0x1e   : > { %p781_p1 = scmp.lt.s32.totalorder %s1053_s28, 4  ;;  %s207_s29 = sand.u32 1, %s1033_s23  }
  0x1f   : > { %p1189_p2 = por %p181_p0, %p180_p13  ;;  %s694_s9 = sshll.u32 %s207_s29, 5 }
  0x20   : > { %s722_s13 = sshll.u32 %s1049_s27, 4  ;;  %s211_s7 = scalar_lea.vmem [#allocation3], %s694_s9 }
  0x21   : > { %s217_s14 = sadd.s32 %s1045_s26, %s722_s13  ;;  %s220_s6 = sshll.u32 %s211_s7, 4  ;;  %s221_s6 = int_to_ptr.vmem [resolvable:$true] %s220_s6 }
  0x22   : > { %s697_s5 = sshll.u32 %s217_s14, 6  ;;  %p1201_p4 = pnand %p781_p1, %p1160_p3 }
  0x23   : > { %s219_s8 = scalar_lea.hbm %s1326_s0, %s697_s5  ;;  %s208_s17 = scalar_lea.sflag [#allocation4], %s207_s29 }
  0x24   : > { %p907_p5 = pneg %p1201_p4  ;;  %s918_s23 = scalar_lea.vmem %s221_s6, 512 }
  0x25   : > { %p919_p6 = scmp.ne.s32.totalorder %s221_s6, %s918_s23  ;;  %s1055_s7 = smov [#allocation3]  }
  0x26   : > { %s923_s9 = sshll.u32 %s1055_s7, 4  ;;  %s924_s9 = int_to_ptr.vmem [resolvable:$false] %s923_s9 }
  0x27   : > { %p921_p8 = pnand %p919_p6, %p907_p5  ;;  %s925_s13 = scalar_lea.vmem %s924_s9, 1024 }
  0x28   : > { %p926_p10 = scmp.lt.s32.totalorder %s221_s6, %s924_s9  ;;  %p927_p11 = scmp.lt.s32.totalorder %s925_s13, %s918_s23 }
  0x29   : > { %p922_p9 = pneg %p921_p8 }
  0x2a   : > { %p928_p13 = por %p927_p11, %p926_p10 }
  0x2c   : > { %p929_p0 = pnand %p928_p13, %p922_p9 }
  0x2e   : > { %932 = shalt.err (!%p929_p0)
}
  0x2f   : > { %s1056_s5 = smov 128   ;;  %s1057_s10 = smov 64  }
  0x30   : > { %s1058_s15 = smov 4   ;;  %p698_p3 = scmp.ge.s32.totalorder %s1053_s28, 1 }
  0x31   : > { %776 = dma.hbm_to_vmem [thread:$0]  (!%p1201_p4), %s219_s8, 512, %s221_s6, %s208_s17, %s1056_s5, %s1057_s10, %s1058_s15  }
  0x32   : > { %p245_p1 = scmp.lt.s32.totalorder %s1053_s28, 5 }
  0x34   : > { %p246_p5 = pnand %p698_p3, %p245_p1 }
  0x35   : > { %s251_s29 = sand.u32 (!%p246_p5), 1, %s1029_s22  }
  0x36   : > { %249 = sbr.rel (%p246_p5) target bundleno = 843 (0x34b), region = 40  ;;  %s699_s14 = sshll.u32 (!%p246_p5), %s251_s29, 5 }
  0x37   : > { %s252_s23 = scalar_lea.sflag (!%p246_p5), [#allocation4], %s251_s29  ;;  %s1212_s11 = scalar_lea.vmem (!%p246_p5), [#allocation3], %s699_s14 }
  0x3b   : > { %1004 = dma.done.wait (%p1168_p7), %s252_s23, 512  }
  0x3c   : > { %1006 = vsyncadd (%p1168_p7), %s252_s23, 4294966784  ;;  %s290_s6 = sand.u32 1, %s1017_s19   ;;  %p294_p4 = scmp.lt.s32.totalorder %s1041_s25, 1 }
  0x3d   : > { %s1222_s17 = sshll.u32 %s290_s6, 3  ;;  %p296_p6 = scmp.lt.s32.totalorder %s1037_s24, 1 }
  0x3e   : > { %s295_s8 = scalar_select %p294_p4, %s1041_s25, 1 }
  0x3f   : > { %s297_s30 = scalar_select %p296_p6, %s1037_s24, 1 }
  0x40   : > { %s701_s7 = sshll.u32 %s295_s8, 1  ;;  %s702_s9 = sshll.u32 %s295_s8, 3 }
  0x41   : > { %s1227_s13 = sadd.s32 %s701_s7, %s297_s30  ;;  %s1232_s10 = scalar_lea.vmem %s1328_s2, %s702_s9 }
  0x42   : > { %s300_s14 = scalar_lea.vmem %s1327_s1, %s1227_s13  ;;  %s292_s23 = scalar_lea.vmem [#allocation6], %s1222_s17 }
  0x43   : > { %p703_p7 = scmp.ne.s32.totalorder %s1037_s24, 0 }
  0x45   : > { %309 = sbr.rel (%p703_p7) target bundleno = 76 (0x4c), region = 48 }
  0x4a   : > { %vm310_vm0 = vcmask 261120   ;;  %v1059_v0 = vmov 0.0  }
  0x4b   : > { %311 = vst.msk [vmem:[#allocation2] sm:$0xff] %vm310_vm0, %v1059_v0 }
  0x4c PF: > { %v878_v1 = vld [vmem:[%s1329_s3 + $0x8] sm:$0xff]   ;;  %v879_v2 = vld [vmem:[%s1329_s3] sm:$0xff]   ;;  %vm363_vm1 = vcmask 261120   ;;  %v881_v4 = vld [vmem:[%s1212_s11 + $0x8] sm:$0xff]   ;;  %v1060_v7 = vmov 0.0   ;;  %vm1061_vm2 = vmmov 0   ;;  %v450_v22 = vlaneseq }
  0x4d   : > { %738 = vmatprep.subr.bf16.mxu0 %v878_v1  ;;  %v880_v3 = vld [vmem:[%s1212_s11] sm:$0xff]   ;;  %v882_v5 = vld [vmem:[%s1212_s11 + $0x10] sm:$0xff]   ;;  %v883_v6 = vld [vmem:[%s1212_s11 + $0x18] sm:$0xff]   ;;  %750 = vmatprep.subr.mxu1 %v1060_v7  ;;  %vm468_vm6 = vcmask 523264   ;;  %p717_p8 = scmp.ne.s32.totalorder %s1037_s24, 1 }
  0x4e   : > { %739 = vmatpush3.bf16.msra.mxu0 %v878_v1  ;;  %742 = vmatprep.mubr.msk.bf16.mxu0 %vm363_vm1, %v880_v3  ;;  %v704_v14 = vld [vmem:[%s1330_s4] ss:$0 sm:$0xff]  ;;  %v451_v25 = vshrl.u32 %v450_v22, 7  ;;  %v453_v30 = vand.u32 127, %v450_v22 }
  0x4f   : > { %740 = vmatprep.subr.bf16.mxu0 %v879_v2  ;;  %766 = vmatprep.mubr.msk.f32.mxu1 %vm1061_vm2, %v1060_v7  ;;  %v715_v37 = vld [vmem:[%s300_s14] ss:$0 sm:$0xff] }
  0x50   : > { %v456_v27 = vadd.s32 1, %v451_v25  ;;  %v454_v31 = vmul.u32 8, %v451_v25 }
  0x52   : > { %741 = vmatpush3.bf16.msra.mxu0 %v879_v2  ;;  %v457_v32 = vmul.u32 8, %v456_v27  ;;  %vm455_vm3 = vcmp.ge.s32.totalorder %v453_v30, %v454_v31  ;;  %v467_v41 = vld [vmem:[#allocation2] sm:$0xff] }
  0x54   : > { %vm458_vm4 = vcmp.lt.s32.totalorder %v453_v30, %v457_v32 }
  0x55   : > { %743 = vmatmul.mubr.msk.bf16.vlgmr.msra.gmra.mxu0 %vm363_vm1, %v881_v4  ;;  %vm459_vm5 = vmand %vm455_vm3, %vm458_vm4 }
  0x56   : > { %746 = vmatprep.mubr.msk.bf16.mxu0 %vm363_vm1, %v882_v5  ;;  %v466_v39 = vsel %vm459_vm5, %v715_v37, 0.0 }
  0x5d   : > { %747 = vmatmul.mubr.msk.bf16.gmra.mxu0 %vm363_vm1, %v883_v6 }
 0x115   : > { %v744_v8 = vpop.f32.mrf.mxu0 }
 0x116   : > { %v419_v23 = vadd.f32 %v744_v8, %v704_v14 }
 0x117   : > { %v410_v9 = vpop.f32.mrf.mxu0 }
 0x118   : > { %v411_v26 = vadd.f32 %v704_v14, %v410_v9 }
 0x119   : > { %v745_v10 = vpop.f32.mrf.mxu0 }
 0x11a   : > { %v422_v21 = vadd.f32 %v745_v10, %v704_v14 }
 0x11b   : > { %v413_v11 = vpop.f32.mrf.mxu0 }
 0x11c   : > { %v414_v24 = vadd.f32 %v704_v14, %v413_v11 }
 0x11d   : > { %v748_v12 = vpop.f32.mrf.mxu0 }
 0x11e   : > { %v435_v16 = vadd.f32 %v748_v12, %v704_v14 }
 0x11f   : > { %v426_v13 = vpop.f32.mrf.mxu0 }
 0x120   : > { %v427_v20 = vadd.f32 %v704_v14, %v426_v13 }
 0x121   : > { %v749_v15 = vpop.f32.mrf.mxu0 }
 0x122   : > { %v438_v17 = vadd.f32 %v749_v15, %v704_v14 }
 0x123   : > { %v429_v18 = vpop.f32.mrf.mxu0 }
 0x124   : > { %884 = vtanh.f32 %v438_v17  ;;  %v430_v19 = vadd.f32 %v704_v14, %v429_v18 }
 0x125   : > { %886 = vtanh.f32 %v435_v16 }
 0x126   : > { %888 = vtanh.f32 %v430_v19 }
 0x127   : > { %890 = vtanh.f32 %v427_v20 }
 0x128   : > { %892 = vtanh.f32 %v422_v21 }
 0x129   : > { %894 = vtanh.f32 %v419_v23 }
 0x12a   : > { %896 = vtanh.f32 %v414_v24 }
 0x12b   : > { %898 = vtanh.f32 %v411_v26 }
 0x131   : > { %v885_v28 = vpop.eup %884 }
 0x132   : > { %751 = vmatpush3.msra.mxu1 %v885_v28  ;;  %v887_v29 = vpop.eup %886 }
 0x133   : > { %752 = vmatprep.subr.mxu1 %v1060_v7  ;;  %v889_v33 = vpop.eup %888 }
 0x134   : > { %753 = vmatpush3.msra.mxu1 %v887_v29  ;;  %v891_v34 = vpop.eup %890 }
 0x135   : > { %754 = vmatprep.subr.mxu1 %v1060_v7  ;;  %v893_v35 = vpop.eup %892 }
 0x136   : > { %755 = vmatpush3.msra.mxu1 %v889_v33  ;;  %v895_v36 = vpop.eup %894 }
 0x137   : > { %756 = vmatprep.subr.mxu1 %v1060_v7  ;;  %v897_v38 = vpop.eup %896 }
 0x138   : > { %757 = vmatpush3.msra.mxu1 %v891_v34  ;;  %v899_v40 = vpop.eup %898 }
 0x139   : > { %758 = vmatprep.subr.mxu1 %v1060_v7 }
 0x13a   : > { %759 = vmatpush3.msra.mxu1 %v893_v35 }
 0x13b   : > { %760 = vmatprep.subr.mxu1 %v1060_v7 }
 0x13c   : > { %761 = vmatpush3.msra.mxu1 %v895_v36 }
 0x13d   : > { %762 = vmatprep.subr.mxu1 %v1060_v7 }
 0x13e   : > { %763 = vmatpush3.msra.mxu1 %v897_v38 }
 0x13f   : > { %764 = vmatprep.subr.mxu1 %v1060_v7 }
 0x140   : > { %765 = vmatpush3.msra.mxu1 %v899_v40 }
 0x141   : > { %767 = vmatmul.mubr.msk.f32.vlgmr.msra.gmra.mxu1 %vm468_vm6, %v466_v39 }
 0x200   : > { %547 = sbr.rel (%p717_p8) target bundleno = 820 (0x334), region = 52 }
 0x201   : > { %v538_v42 = vpop.f32.mrf.mxu1 }
 0x202   : > { %v542_v43 = vadd.f32 %v538_v42, %v467_v41 }
 0x203   : > { %v768_v44 = vpop.f32.mrf.mxu1 }
 0x204   : > { %543 = vst.msk [vmem:[#allocation2] sm:$0xff] %vm363_vm1, %v542_v43 }
 0x205   : > { %v548_v45 = vld [vmem:[%s1232_s10] sm:$0xff]  ;;  %v1062_v46 = vmov 0  }
 0x206   : > { %900 = vset.pattern.permute.xlu0 %v1062_v46  ;;  %v549_v47 = vmax.f32 %v548_v45, 1.0 }
 0x208   : > { %901 = vrcp.f32 %v549_v47 }
 0x20b   : > { %v550_v49 = vld [vmem:[#allocation2] sm:$0xff] }
 0x215   : > { %v902_v48 = vpop.eup %901 }
 0x216   : > { %554 = vperm.xlu0 %900, %v902_v48  }
 0x291   : > { %v555_v50 = vpop.permute.xlu0 %554 }
 0x292   : > { %v557_v51 = vmul.f32 %v555_v50, %v550_v49 }
 0x294   : > { %v558_v52 = vmul.f32 %v557_v51, %v557_v51 }
 0x296   : > { %v559_v53 = vsel %vm363_vm1, %v558_v52, 0.0 }
 0x297   : > { %560 = vadd.xlane.f32.xlu0 %v559_v53 }
 0x320   : > { %v561_v54 = vpop.xlane.xlu0 %560 }
 0x321   : > { %v562_v55 = vmax.f32 %v561_v54, 1e-30 }
 0x323   : > { %903 = vrsqrt.f32 %v562_v55 }
 0x330   : > { %v904_v56 = vpop.eup %903 }
 0x331   : > { %v564_v57 = vmul.f32 %v904_v56, %v557_v51 }
 0x333   : > { %565 = vst.msk [vmem:[%s292_s23] sm:$0xff] %vm363_vm1, %v564_v57 }
 0x334 PF: > { %s719_s13 = sshll.u32 %s1041_s25, 7  ;;  %s1350_s14 = sld [smem:[#allocation14_spill]] }
 0x335   : > { %s580_s30 = sshll.u32 %s292_s23, 4  ;;  %s567_s7 = scalar_lea.sflag [#allocation5], %s290_s6  ;;  %s581_s30 = int_to_ptr.vmem [resolvable:$true] %s580_s30 }
 0x336   : > { %s933_s9 = scalar_lea.vmem %s581_s30, 128  ;;  %s1063_s12 = smov [#allocation6]  }
 0x337   : > { %p934_p9 = scmp.ne.s32.totalorder %s581_s30, %s933_s9  ;;  %s937_s5 = sshll.u32 %s1063_s12, 4  ;;  %s938_s5 = int_to_ptr.vmem [resolvable:$false] %s937_s5 }
 0x338   : > { %s939_s11 = scalar_lea.vmem %s938_s5, 256  ;;  %p940_p13 = scmp.lt.s32.totalorder %s581_s30, %s938_s5 }
 0x339   : > { %p935_p10 = pnand %p934_p9, %p1176_p12  ;;  %p941_p0 = scmp.lt.s32.totalorder %s939_s11, %s933_s9 }
 0x33a   : > { %s578_s8 = scalar_lea.hbm %s1350_s14, %s719_s13 }
 0x33b   : > { %p936_p11 = pneg %p935_p10  ;;  %p942_p3 = por %p941_p0, %p940_p13 }
 0x33d   : > { %p943_p1 = pnand %p942_p3, %p936_p11 }
 0x33f   : > { %946 = shalt.err (!%p943_p1)
}
 0x340   : > { %s947_s25 = scalar_lea.hbm %s578_s8, 128  ;;  %s951_s23 = scalar_lea.hbm %s1350_s14, 256 }
 0x341   : > { %p948_p5 = scmp.ne.s32.totalorder %s578_s8, %s947_s25  ;;  %p952_p7 = scmp.lt.s32.totalorder %s578_s8, %s1350_s14 }
 0x342   : > { %p953_p8 = scmp.lt.s32.totalorder %s951_s23, %s947_s25 }
 0x343   : > { %p949_p4 = pnand %p948_p5, %p1176_p12 }
 0x344   : > { %p954_p9 = por %p953_p8, %p952_p7 }
 0x345   : > { %p950_p6 = pneg %p949_p4 }
 0x347   : > { %p955_p10 = pnand %p954_p9, %p950_p6 }
 0x349   : > { %958 = shalt.err (!%p955_p10)
}
 0x34a   : > { %771 = dma.vmem_to_hbm [thread:$0]  (%p1176_p12), %s581_s30, 128, %s578_s8, %s567_s7  }
 0x34b PF: > { %p782_p11 = scmp.ge.s32.totalorder %s1053_s28, 2  ;;  %s592_s10 = sand.u32 1, %s1013_s18  }
 0x34c   : > { %s593_s29 = scalar_lea.sflag [#allocation5], %s592_s10 }
 0x34d   : > { %p778_p13 = pnand %p782_p11, %p1189_p2 }
 0x34f   : > { %p779_p0 = pneg %p778_p13 }
 0x351   : > { %1008 = dma.done.wait (%p779_p0), %s593_s29, 128  }
 0x352   : > { %1010 = vsyncadd (%p779_p0), %s593_s29, 4294967168  ;;  %s21_s28 = sadd.s32 1, %s1053_s28   ;;  %s1351_s24 = sld [smem:[#allocation9_spill]] }
 0x353   : > { %p18_p3 = scmp.ge.s32.totalorder %s21_s28, 6   ;;  %s1352_s23 = sld [smem:[#allocation13_spill]] }
 0x354   : > { %s1353_s8 = sld [smem:[#allocation10_spill]]  ;;  %s1355_s18 = smov %s1017_s19 }
 0x355   : > { %s1354_s30 = sld [smem:[#allocation11_spill]]  ;;  %s1356_s19 = smov %s1021_s20 }
 0x356   : > { %s1357_s20 = smov %s1181_s16  ;;  %s1358_s21 = smov %s1029_s22 }
 0x357   : > { %s1361_s25 = smov %s1049_s27  ;;  %20 = sbr.rel (!%p18_p3) target bundleno = 11 (0xb), region = 99 }
 0x358   : > { %s1359_s22 = smov %s1351_s24  ;;  %s1360_s24 = smov %s1045_s26 }
 0x35a   : > { %s1362_s26 = smov %s1353_s8 }
 0x35b   : > { %s1363_s27 = smov %s1354_s30 }
 0x35c   :  { %598 = vsyncpa [#allocation4], 1 }
 0x35d   :  { %600 = vsyncpa [#allocation4 + $0x1], 1 }
 0x35e   :  { %601 = vsyncpa [#allocation5], 1 }
 0x35f   :  { %603 = vsyncpa [#allocation5 + $0x1], 1 }

</bundles_post_ra>
